<compile_context>
chip_gen: v5e
topology: v5e:2x2
jax: 0.10.0
libtpu: 0.0.40
codegen_flags: <defaults>
</compile_context>

<pallas_src>
import jax
import jax.numpy as jnp
from jax.experimental import pallas as pl
from jax.experimental.pallas import tpu as pltpu


def dummy_transformer_block(x):
    """Forward pass of DummyTransformerBlock: returns x unchanged.

    The module is a pure identity, so the optimal implementation performs no
    HBM traffic at all and simply returns the input.
    """
    return x


# ---------------------------------------------------------------------------
# Optional materialized-copy path (only if a caller truly requires a fresh
# buffer). Implemented as one HBM->HBM DMA; no VMEM staging, no grid.
# ---------------------------------------------------------------------------
def _hbm_copy_kernel(x_hbm, o_hbm, sem):
    # Single full-array DMA: src HBM ref -> dst HBM ref.
    cp = pltpu.make_async_copy(x_hbm, o_hbm, sem)
    cp.start()
    cp.wait()


def dummy_transformer_block_materialized(x):
    """Identity forward that returns a freshly materialized copy of x.

    Uses memory_space=pl.ANY on both sides so the tensor never round-trips
    through VMEM; the copy is a single DMA at HBM roofline.
    NOTE: if the caller donates x (jit donate_argnums), prefer adding
    input_output_aliases={0: 0} at the call site instead of paying for the
    copy; without donation the alias would force a defensive copy, so it is
    intentionally not used here.
    """
    return pl.pallas_call(
        _hbm_copy_kernel,
        out_shape=jax.ShapeDtypeStruct(x.shape, x.dtype),
        in_specs=[pl.BlockSpec(memory_space=pl.ANY)],
        out_specs=pl.BlockSpec(memory_space=pl.ANY),
        scratch_shapes=[pltpu.SemaphoreType.DMA],
    )(x)


if __name__ == "__main__":
    # DummyTransformerBlock.__init__ takes cfg but defines no parameters,
    # so there is nothing to initialize.
    key = jax.random.PRNGKey(0)
    B, T, D = 2, 8, 32  # batch=2, seq=8, hidden=32
    x = jax.random.normal(key, (B, T, D), dtype=jnp.float32)

    # Primary (optimal) path: zero-cost identity.
    y = dummy_transformer_block(x)
    jax.block_until_ready(y)
    assert y.shape == x.shape and y.dtype == x.dtype
    assert bool(jnp.array_equal(y, x))

    # Materialized-copy path: exercise the Pallas HBM->HBM DMA kernel once.
    y_copy = dummy_transformer_block_materialized(x)
    jax.block_until_ready(y_copy)
    assert y_copy.shape == x.shape and y_copy.dtype == x.dtype
    assert bool(jnp.array_equal(y_copy, x))

    print("KERNEL_OK")
</pallas_src>

<mosaic_0001>
module attributes {stable_mosaic.version = 11 : i64} {
  func.func @_hbm_copy_kernel(%arg0: memref<2x8x32xf32, #tpu.memory_space<any>>, %arg1: memref<2x8x32xf32, #tpu.memory_space<any>>, %arg2: memref<!tpu.dma_semaphore, #tpu.memory_space<semaphore_mem>>) attributes {dimension_semantics = [], scalar_prefetch = 0 : i64, scratch_operands = 1 : i64, tpu.core_type = #tpu.core_type<tc>} {
    tpu.enqueue_dma source(%arg0 : memref<2x8x32xf32, #tpu.memory_space<any>>) target(%arg1 : memref<2x8x32xf32, #tpu.memory_space<any>>) target_semaphore(%arg2 : memref<!tpu.dma_semaphore, #tpu.memory_space<semaphore_mem>>)
    tpu.wait_dma2 semaphore(%arg2 : memref<!tpu.dma_semaphore, #tpu.memory_space<semaphore_mem>>) src(%arg0 : memref<2x8x32xf32, #tpu.memory_space<any>>) dst(%arg1 : memref<2x8x32xf32, #tpu.memory_space<any>>)
    return
  }
}

</mosaic_0001>

<bundles_post_ra>
// kernel: tpu_custom_call.1
= control target key start
LH: loop header
LB: loop body
LE: loop exit
PB: predicated region body
PF: predicated region fallthrough
CT: control target
= control target key end

     0   :  { %s33_s12 = smov [#allocation2]   ;;  %s34_s13 = smov [#allocation3]   ;;  %s52_s0 = inlined_call_operand.hbm [shape: f32[2,8,32], index: 0, kind: input, shape index: {}]   ;;  %s53_s1 = inlined_call_operand.hbm [shape: f32[2,8,32], index: 1, kind: output, shape index: {}]  }
   0x1   :  { %s10_s8 = sshll.u32 %s52_s0, 4  ;;  %s12_s11 = sshll.u32 %s53_s1, 4  ;;  %s11_s8 = int_to_ptr.hbm [resolvable:$true] %s10_s8  ;;  %s13_s11 = int_to_ptr.hbm [resolvable:$true] %s12_s11 }
   0x2   :  { %s35_s14 = smov 0  }
   0x3   :  { %16 = dma.general %s11_s8, 256, %s13_s11, %s33_s12, %s34_s13, [#allocation4], %s35_s14, 0  }
   0x4   :  { %31 = dma.done.wait [#allocation2], 256 }
   0x5   :  { %32 = vsyncadd [#allocation2], 4294967040 }
   0x6   :  { %21 = vsyncmov [#allocation2] }
   0x9   :  { %s22_s15 = vpop.sfrf %21 }
   0xa   :  { %p27_p0 = scmp.ne.s32.totalorder %s22_s15, 0 }
   0xc   :  { %26 = shalt.err (%p27_p0)  }

</bundles_post_ra>
